<compile_context>
chip_gen: v6e
topology: v6e:2x2x1
jax: 0.10.0
libtpu: 0.0.40
codegen_flags: <defaults>
</compile_context>

<pallas_src>
import functools

import jax
import jax.numpy as jnp
from jax.experimental import pallas as pl
from jax.experimental.pallas import tpu as pltpu

LANE = 128
SUBLANE = 8

_BUFFERED1_OK = None


def _round_up(x, m):
    return ((x + m - 1) // m) * m


def _vmem_capacity_bytes():
    try:
        return int(pltpu.get_tpu_info().vmem_capacity_bytes)
    except Exception:
        return 64 * 1024 * 1024  # conservative (v7x per-TensorCore)


def _probe_copy_kernel(x_ref, o_ref):
    o_ref[...] = x_ref[...]


def _single_buffer_supported():
    """Probe once whether pipeline_mode=pl.Buffered(1) is accepted & correct.

    Constant-index blocks kept single-buffered halve their VMEM footprint
    (biggest win on v7x, 64 MiB VMEM). Falls back to default double-buffering
    if this JAX build rejects it.
    """
    global _BUFFERED1_OK
    if _BUFFERED1_OK is None:
        try:
            fn = pl.pallas_call(
                _probe_copy_kernel,
                grid=(2,),
                in_specs=[pl.BlockSpec((SUBLANE, LANE), lambda i: (0, 0),
                                       pipeline_mode=pl.Buffered(1))],
                out_specs=pl.BlockSpec((SUBLANE, LANE), lambda i: (i, 0)),
                out_shape=jax.ShapeDtypeStruct((2 * SUBLANE, LANE), jnp.float32),
            )
            out = fn(jnp.ones((SUBLANE, LANE), jnp.float32))
            jax.block_until_ready(out)
            _BUFFERED1_OK = bool(jnp.all(out == 1.0))
        except Exception:
            _BUFFERED1_OK = False
    return _BUFFERED1_OK


def _fused_heads_kernel(x_ref, w_ref, b_ref, *rest, head_layout, apply_act,
                        has_cross, n_k):
    """One (batch tile, k tile) grid point.

    logits = x @ W_all + b_all     (all heads fused on the class axis;
                                    accumulated over k tiles when n_k > 1)
    eval:     per-head softmax/sigmoid on static lane-aligned column slices
    training: logits passed through; optional fused cross projections:
              cross = logits @ Wc_all   (block-structured, zero elsewhere)
    """
    refs = list(rest)
    wc_ref = refs.pop(0) if has_cross else None
    o_ref = refs.pop(0)
    oc_ref = refs.pop(0) if has_cross else None
    acc_ref = refs.pop(0) if n_k > 1 else None

    def finalize(acc_f32):
        logits = acc_f32 + b_ref[...].astype(jnp.float32)

        if apply_act:
            # Per-head activations on static, 128-aligned column slices:
            # no full-width masking, stores stay lane-dense.
            for start, size, psize, act in head_layout:
                seg = logits[:, start:start + psize]
                if act == "softmax":            # nn.Softmax(dim=1)
                    if size == psize:
                        m = jnp.max(seg, axis=-1, keepdims=True)
                        e = jnp.exp(seg - m)
                    else:
                        col = jax.lax.broadcasted_iota(jnp.int32, seg.shape, 1)
                        valid = col < size
                        m = jnp.max(jnp.where(valid, seg, -1e30),
                                    axis=-1, keepdims=True)
                        e = jnp.where(valid, jnp.exp(seg - m), 0.0)
                    seg = e / jnp.sum(e, axis=-1, keepdims=True)
                elif act == "sigmoid":          # nn.Sigmoid(), numerically stable
                    e = jnp.exp(-jnp.abs(seg))
                    seg = jnp.where(seg >= 0, 1.0 / (1.0 + e), e / (1.0 + e))
                # else: identity (not produced by the spec'd act funcs)
                o_ref[:, start:start + psize] = seg.astype(o_ref.dtype)
        else:
            o_ref[...] = logits.astype(o_ref.dtype)

        if has_cross:
            # Fused bias-free cross-dataset projections on the in-VMEM logits.
            # TODO(synk): logits are quantized to the weight dtype (bf16) before
            # the second MXU matmul — one extra rounding vs the f32 PyTorch ref.
            cross = jnp.dot(logits.astype(wc_ref.dtype), wc_ref[...],
                            preferred_element_type=jnp.float32)
            oc_ref[...] = cross.astype(oc_ref.dtype)

    if n_k == 1:
        finalize(jnp.dot(x_ref[...], w_ref[...],
                         preferred_element_type=jnp.float32))
    else:
        k = pl.program_id(1)

        @pl.when(k == 0)
        def _():
            acc_ref[...] = jnp.zeros_like(acc_ref)

        acc_ref[...] += jnp.dot(x_ref[...], w_ref[...],
                                preferred_element_type=jnp.float32)

        @pl.when(k == n_k - 1)
        def _():
            finalize(acc_ref[...])


def fused_heads_forward(x, w, b_row, wc=None, *, head_layout, apply_act,
                        out_dtype=jnp.float32, max_block_b=None,
                        max_weight_vmem_bytes=None):
    """y = act(x @ W + b) (+ optional fused cross projections), one pallas_call."""
    B, D = x.shape
    Cpad = w.shape[1]
    Ccpad = wc.shape[1] if wc is not None else 0
    itemsize_w = jnp.dtype(w.dtype).itemsize
    itemsize_x = jnp.dtype(x.dtype).itemsize

    single_buf = _single_buffer_supported()
    const_bufs = 1 if single_buf else 2
    cap = _vmem_capacity_bytes()
    if max_weight_vmem_bytes is None:
        max_weight_vmem_bytes = int(0.4 * cap)

    # ---- batch tiling: >=2 "parallel" steps whenever padded batch >= 16 so
    # both v7x TensorCores get work; bigger tiles on the matmul-only path.
    if max_block_b is None:
        max_block_b = 128 if apply_act else 256
    Bp8 = _round_up(B, SUBLANE)
    block_b = min(max_block_b, Bp8)
    if block_b == Bp8 and Bp8 >= 2 * SUBLANE:
        block_b = _round_up(Bp8 // 2, SUBLANE)
    Bp = _round_up(B, block_b)

    # ---- K (dim_in) tiling fallback once the resident fused weight would not
    # comfortably fit VMEM (binding constraint on v7x's 64 MiB).
    wc_res = Cpad * Ccpad * itemsize_w * const_bufs
    w_res = D * Cpad * itemsize_w * const_bufs
    if w_res + wc_res <= max_weight_vmem_bytes:
        block_k, Dp, n_k = D, D, 1
    else:
        avail = max(max_weight_vmem_bytes - wc_res, 2 * LANE * Cpad * itemsize_w)
        block_k = max(LANE, (avail // (2 * Cpad * itemsize_w)) // LANE * LANE)
        block_k = min(block_k, _round_up(D, LANE))
        Dp = _round_up(D, block_k)
        n_k = Dp // block_k

    if Bp != B or Dp != D:
        x = jnp.pad(x, ((0, Bp - B), (0, Dp - D)))
    if Dp != D:
        w = jnp.pad(w, ((0, Dp - D), (0, 0)))

    grid = (Bp // block_b, n_k)

    def _const_spec(shape):
        if single_buf:
            return pl.BlockSpec(shape, lambda i, k: (0, 0),
                                pipeline_mode=pl.Buffered(1))
        return pl.BlockSpec(shape, lambda i, k: (0, 0))

    if n_k == 1:
        w_spec = _const_spec((Dp, Cpad))                 # whole weight resident
    else:
        w_spec = pl.BlockSpec((block_k, Cpad), lambda i, k: (k, 0))

    in_specs = [
        pl.BlockSpec((block_b, block_k), lambda i, k: (i, k)),   # x tile
        w_spec,                                                  # fused head W
        _const_spec((1, Cpad)),                                  # fused bias row
    ]
    operands = [x, w, b_row]
    out_shape = [jax.ShapeDtypeStruct((Bp, Cpad), out_dtype)]
    out_specs = [pl.BlockSpec((block_b, Cpad), lambda i, k: (i, 0))]

    if wc is not None:
        in_specs.append(_const_spec((Cpad, Ccpad)))
        operands.append(wc)
        out_shape.append(jax.ShapeDtypeStruct((Bp, Ccpad), out_dtype))
        out_specs.append(pl.BlockSpec((block_b, Ccpad), lambda i, k: (i, 0)))

    scratch_shapes = []
    if n_k > 1:
        scratch_shapes.append(pltpu.VMEM((block_b, Cpad), jnp.float32))

    # Explicit scoped-VMEM limit sized to the actual operand / buffer footprint
    # (defaults are only 16 MiB on v5e, 32 MiB on v6e/v7x).
    w_bufs = const_bufs if n_k == 1 else 2
    vmem_needed = (
        block_b * block_k * itemsize_x * 2
        + block_k * Cpad * itemsize_w * w_bufs
        + Cpad * 4 * const_bufs
        + block_b * Cpad * 4 * 2
        + (block_b * Cpad * 4 if n_k > 1 else 0)
        + (Cpad * Ccpad * itemsize_w * const_bufs if wc is not None else 0)
        + (block_b * Ccpad * 4 * 2 if wc is not None else 0)
    )
    vmem_limit = int(min(cap, max(int(vmem_needed * 1.3) + (2 << 20), 32 << 20)))

    flops = 2 * Bp * Dp * Cpad + (2 * Bp * Cpad * Ccpad if wc is not None else 0)
    cost = pl.CostEstimate(
        flops=flops,
        transcendentals=(Bp * Cpad if apply_act else 0),
        bytes_accessed=(Bp * Dp * itemsize_x + Dp * Cpad * itemsize_w
                        + Cpad * 4 + Bp * Cpad * 4
                        + (Cpad * Ccpad * itemsize_w + Bp * Ccpad * 4
                           if wc is not None else 0)),
    )

    kernel = functools.partial(
        _fused_heads_kernel,
        head_layout=tuple(head_layout),
        apply_act=apply_act,
        has_cross=wc is not None,
        n_k=n_k,
    )
    return pl.pallas_call(
        kernel,
        grid=grid,
        in_specs=in_specs,
        out_specs=tuple(out_specs) if wc is not None else out_specs[0],
        out_shape=tuple(out_shape) if wc is not None else out_shape[0],
        scratch_shapes=scratch_shapes,
        compiler_params=pltpu.CompilerParams(
            dimension_semantics=("parallel", "arbitrary"),
            vmem_limit_bytes=vmem_limit),
        cost_estimate=cost,
    )(*operands)


class TransformerMultiHeadPallas:
    """JAX/Pallas re-implementation of TransformerMultiHead.forward (use_MLP=False)."""

    def __init__(self, dim_in, dataset_names, dataset_num_classes, act_funcs,
                 dropout_rate=0.0, add_cross_proj=False,
                 param_dtype=jnp.bfloat16, key=None,
                 max_weight_vmem_bytes=None):
        assert len(dataset_names) == len(dataset_num_classes) == len(act_funcs)
        for a in act_funcs:
            if a not in ("softmax", "sigmoid"):
                raise NotImplementedError(
                    "{} is not supported as an activation function.".format(a))
        if key is None:
            key = jax.random.PRNGKey(0)
        self.dim_in = dim_in
        self.dataset_names = list(dataset_names)
        self.acts = dict(zip(dataset_names, act_funcs))
        self.add_cross_proj = add_cross_proj
        self.dropout_rate = dropout_rate
        self.param_dtype = param_dtype
        self.max_weight_vmem_bytes = max_weight_vmem_bytes
        # TODO(synk): dropout_rate > 0.0 training-time dropout not implemented
        # (forward mirrors dropout_rate == 0.0 / eval behaviour).
        # TODO(synk): use_moco / moco momentum heads not implemented.

        # per-dataset linear heads, weights stored transposed (dim_in, C) in the
        # MXU feed dtype (bf16 by default); biases kept f32 (added post-acc).
        self.params = {}
        for i, name in enumerate(dataset_names):
            C = dataset_num_classes[i]
            kw, kb = jax.random.split(jax.random.fold_in(key, i))
            bound = 1.0 / (dim_in ** 0.5)
            w = jax.random.uniform(kw, (dim_in, C), jnp.float32, -bound, bound)
            b = jax.random.uniform(kb, (C,), jnp.float32, -bound, bound)
            self.params[name] = (w.astype(param_dtype), b.astype(jnp.float32))

        # bias-free cross-dataset projections "<d1>_<d2>": Linear(C_d1 -> C_d2)
        self.cross = {}   # proj_name -> (d1_name, d2_name, w of shape (C_d1, C_d2))
        if add_cross_proj:
            idx = 100
            for i, name in enumerate(dataset_names):
                for j, other in enumerate(dataset_names):
                    if other == name:
                        continue
                    proj_name = "%s_%s" % (other, name)
                    c_in, c_out = dataset_num_classes[j], dataset_num_classes[i]
                    bound = 1.0 / (c_in ** 0.5)
                    kw = jax.random.fold_in(key, idx)
                    idx += 1
                    w = jax.random.uniform(kw, (c_in, c_out), jnp.float32,
                                           -bound, bound)
                    self.cross[proj_name] = (other, name, w.astype(param_dtype))

        self._fused_cache = {}

    # ---------- fused parameter construction (cached) ----------

    def _fused_params(self, run_names):
        key = ("heads",) + tuple(run_names)
        if key in self._fused_cache:
            return self._fused_cache[key]
        ws, bs, layout = [], [], []
        col = 0
        for name in run_names:
            w, b = self.params[name]
            C = w.shape[1]
            Cp = max(_round_up(C, LANE), LANE)   # per-head lane-aligned width
            ws.append(jnp.pad(w, ((0, 0), (0, Cp - C))))
            bs.append(jnp.pad(b, (0, Cp - C)))
            layout.append((name, col, C, Cp, self.acts[name]))
            col += Cp
        W = jnp.concatenate(ws, axis=1)
        b_row = jnp.concatenate(bs).reshape(1, col)
        entry = (W, b_row, tuple(layout), col)
        self._fused_cache[key] = entry
        return entry

    def _fused_cross(self, layout, cpad):
        key = ("cross",) + tuple(n for n, *_ in layout)
        if key in self._fused_cache:
            return self._fused_cache[key]
        offsets = {name: (start, size) for name, start, size, _p, _a in layout}
        total = sum(w.shape[1] for _, _, w in self.cross.values())
        ccpad = max(_round_up(total, LANE), LANE)
        Wc = jnp.zeros((cpad, ccpad), dtype=self.param_dtype)
        cross_layout = []
        col = 0
        for proj_name, (d1, _d2, w) in self.cross.items():
            r0, rc = offsets[d1]
            Wc = Wc.at[r0:r0 + rc, col:col + w.shape[1]].set(w)
            cross_layout.append((proj_name, col, w.shape[1]))
            col += w.shape[1]
        entry = (Wc, tuple(cross_layout))
        self._fused_cache[key] = entry
        return entry

    # ---------- forward ----------

    def forward(self, x, dataset_name=None, training=False, run_cross_proj=False):
        if dataset_name is None:
            run_names = self.dataset_names
        else:
            assert dataset_name in self.params
            run_names = [dataset_name]

        W, b_row, layout, cpad = self._fused_params(tuple(run_names))
        kernel_layout = tuple((start, size, psize, act)
                              for _, start, size, psize, act in layout)
        apply_act = not training
        do_cross = self.add_cross_proj and run_cross_proj
        B = x.shape[0]
        x = x.astype(self.param_dtype)     # feed the MXU natively (bf16)

        if do_cross:
            assert training, ("cross dataset projection is not supposed to be "
                              "used during inf")
            assert dataset_name is None, "cross projections need all head logits"
            Wc, cross_layout = self._fused_cross(layout, cpad)
            heads_p, cross_p = fused_heads_forward(
                x, W, b_row, Wc, head_layout=kernel_layout, apply_act=False,
                max_weight_vmem_bytes=self.max_weight_vmem_bytes)
        else:
            heads_p = fused_heads_forward(
                x, W, b_row, None, head_layout=kernel_layout,
                apply_act=apply_act,
                max_weight_vmem_bytes=self.max_weight_vmem_bytes)

        head_outputs = {}
        for name, start, size, _psize, _act in layout:
            head_outputs[name] = heads_p[:B, start:start + size]
        if do_cross:
            for proj_name, start, size in cross_layout:
                head_outputs[proj_name] = cross_p[:B, start:start + size]
        return head_outputs


if __name__ == "__main__":
    key = jax.random.PRNGKey(0)
    k_x, k_params = jax.random.split(key)

    B, DIM_IN = 8, 32
    dataset_names = ["kinetics", "ava"]
    dataset_num_classes = [16, 24]
    act_funcs = ["softmax", "sigmoid"]

    x = jax.random.normal(k_x, (B, DIM_IN), jnp.float32)

    head = TransformerMultiHeadPallas(
        dim_in=DIM_IN,
        dataset_names=dataset_names,
        dataset_num_classes=dataset_num_classes,
        act_funcs=act_funcs,
        dropout_rate=0.0,
        add_cross_proj=True,
        key=k_params,
    )

    # eval-mode forward: fused linear heads + per-head activations, one kernel
    eval_out = head.forward(x, dataset_name=None, training=False)
    # training-mode forward with fused cross-dataset projections, one kernel
    train_out = head.forward(x, dataset_name=None, training=True,
                             run_cross_proj=True)
    # single-dataset path
    single_out = head.forward(x, dataset_name="ava", training=False)

    for v in (list(eval_out.values()) + list(train_out.values())
              + list(single_out.values())):
        jax.block_until_ready(v)

    # shape checks
    assert eval_out["kinetics"].shape == (B, 16)
    assert eval_out["ava"].shape == (B, 24)
    assert train_out["kinetics"].shape == (B, 16)
    assert train_out["kinetics_ava"].shape == (B, 24)
    assert train_out["ava_kinetics"].shape == (B, 16)
    assert single_out["ava"].shape == (B, 24)

    # numerics vs plain-JAX reference (params stored bf16; quantize x the same)
    xq = x.astype(jnp.bfloat16).astype(jnp.float32)
    w_k, b_k = head.params["kinetics"]
    w_a, b_a = head.params["ava"]
    logits_k = xq @ w_k.astype(jnp.float32) + b_k
    logits_a = xq @ w_a.astype(jnp.float32) + b_a

    row_sums = jnp.sum(eval_out["kinetics"], axis=-1)
    assert jnp.allclose(row_sums, jnp.ones_like(row_sums), atol=1e-3)
    assert jnp.allclose(eval_out["kinetics"], jax.nn.softmax(logits_k, axis=-1),
                        atol=1e-2)
    assert jnp.allclose(eval_out["ava"], jax.nn.sigmoid(logits_a), atol=1e-2)
    assert jnp.allclose(single_out["ava"], jax.nn.sigmoid(logits_a), atol=1e-2)
    assert jnp.allclose(train_out["kinetics"], logits_k, rtol=2e-2, atol=2e-2)
    assert jnp.allclose(train_out["ava"], logits_a, rtol=2e-2, atol=2e-2)
    _, _, w_ka = head.cross["kinetics_ava"]
    assert jnp.allclose(train_out["kinetics_ava"],
                        logits_k @ w_ka.astype(jnp.float32),
                        rtol=3e-2, atol=3e-2)

    # K-tiled accumulator fallback path: force a tiny weight budget so n_k > 1.
    DIM_BIG = 512
    head_big = TransformerMultiHeadPallas(
        dim_in=DIM_BIG,
        dataset_names=dataset_names,
        dataset_num_classes=dataset_num_classes,
        act_funcs=act_funcs,
        add_cross_proj=False,
        key=jax.random.fold_in(k_params, 7),
        max_weight_vmem_bytes=64 * 1024,
    )
    xb = jax.random.normal(jax.random.fold_in(k_x, 7), (B, DIM_BIG), jnp.float32)
    big_out = head_big.forward(xb, dataset_name=None, training=False)
    jax.block_until_ready(big_out["kinetics"])
    xbq = xb.astype(jnp.bfloat16).astype(jnp.float32)
    wbk, bbk = head_big.params["kinetics"]
    wba, bba = head_big.params["ava"]
    ref_k = jax.nn.softmax(xbq @ wbk.astype(jnp.float32) + bbk, axis=-1)
    ref_a = jax.nn.sigmoid(xbq @ wba.astype(jnp.float32) + bba)
    assert big_out["kinetics"].shape == (B, 16)
    assert jnp.allclose(big_out["kinetics"], ref_k, atol=2e-2)
    assert jnp.allclose(big_out["ava"], ref_a, atol=2e-2)

    print("KERNEL_OK")
</pallas_src>

<mosaic_0001>
module attributes {stable_mosaic.version = 11 : i64} {
  func.func @_probe_copy_kernel(%arg0: i32, %arg1: memref<8x128xf32, #tpu.memory_space<vmem>>, %arg2: memref<8x128xf32, #tpu.memory_space<vmem>>) attributes {dimension_semantics = [#tpu.dimension_semantics<arbitrary>], iteration_bounds = array<i64: 2>, scalar_prefetch = 0 : i64, scratch_operands = 0 : i64, tpu.core_type = #tpu.core_type<tc>, window_params = [{pipeline_mode = #tpu.pipeline_mode<synchronous>, transform_indices = @transform_0, window_bounds = array<i64: 8, 128>}, {transform_indices = @transform_1, window_bounds = array<i64: 8, 128>}]} {
    %c0 = arith.constant 0 : index
    %c0_0 = arith.constant 0 : index
    %0 = vector.load %arg1[%c0, %c0_0] : memref<8x128xf32, #tpu.memory_space<vmem>>, vector<8x128xf32>
    %c0_1 = arith.constant 0 : index
    %c0_2 = arith.constant 0 : index
    %1 = vector.load %arg2[%c0_1, %c0_2] : memref<8x128xf32, #tpu.memory_space<vmem>>, vector<8x128xf32>
    tpu.vector_store %arg2[%c0_1, %c0_2], %0 {strides = array<i32>} : memref<8x128xf32, #tpu.memory_space<vmem>>, vector<8x128xf32>,
    return
  }
  func.func @transform_0(%arg0: i32) -> (i32, i32) {
    %c0_i32 = arith.constant 0 : i32
    %c0_i32_0 = arith.constant 0 : i32
    %c0_i32_1 = arith.constant 0 : i32
    return %c0_i32, %c0_i32_0 : i32, i32
  }
  func.func @transform_1(%arg0: i32) -> (i32, i32) {
    %c0_i32 = arith.constant 0 : i32
    %c0_i32_0 = arith.constant 0 : i32
    return %arg0, %c0_i32 : i32, i32
  }
}

module attributes {stable_mosaic.version = 11 : i64} {
  func.func @_fused_heads_kernel(%arg0: i32, %arg1: i32, %arg2: memref<8x32xbf16, #tpu.memory_space<vmem>>, %arg3: memref<32x256xbf16, #tpu.memory_space<vmem>>, %arg4: memref<1x256xf32, #tpu.memory_space<vmem>>, %arg5: memref<8x256xf32, #tpu.memory_space<vmem>>) attributes {dimension_semantics = [#tpu.dimension_semantics<parallel>, #tpu.dimension_semantics<arbitrary>], iteration_bounds = array<i64: 1, 1>, scalar_prefetch = 0 : i64, scratch_operands = 0 : i64, tpu.core_type = #tpu.core_type<tc>, window_params = [{transform_indices = @transform_0, window_bounds = array<i64: 8, 32>}, {pipeline_mode = #tpu.pipeline_mode<synchronous>, transform_indices = @transform_1, window_bounds = array<i64: 32, 256>}, {pipeline_mode = #tpu.pipeline_mode<synchronous>, transform_indices = @transform_2, window_bounds = array<i64: 1, 256>}, {transform_indices = @transform_3, window_bounds = array<i64: 8, 256>}]} {
    %c0 = arith.constant 0 : index
    %c0_0 = arith.constant 0 : index
    %0 = vector.load %arg2[%c0, %c0_0] : memref<8x32xbf16, #tpu.memory_space<vmem>>, vector<8x32xbf16>
    %c0_1 = arith.constant 0 : index
    %c0_2 = arith.constant 0 : index
    %1 = vector.load %arg3[%c0_1, %c0_2] : memref<32x256xbf16, #tpu.memory_space<vmem>>, vector<32x256xbf16>
    %cst = arith.constant dense<0.000000e+00> : vector<8x256xf32>
    %2 = tpu.matmul %0, %1, %cst {dimension_numbers = #tpu.dot_dimension_numbers<[1], [0], [0], [1], [0, 0, 1, 1], [], []>} : vector<8x32xbf16>, vector<32x256xbf16>, vector<8x256xf32> -> vector<8x256xf32>
    %c0_3 = arith.constant 0 : index
    %c0_4 = arith.constant 0 : index
    %3 = vector.load %arg4[%c0_3, %c0_4] : memref<1x256xf32, #tpu.memory_space<vmem>>, vector<1x256xf32>
    %4 = vector.broadcast %3 : vector<1x256xf32> to vector<8x256xf32>
    %5 = arith.addf %2, %4 : vector<8x256xf32>
    %6 = vector.extract_strided_slice %5 {offsets = [0, 0], sizes = [8, 128], strides = [1, 1]} : vector<8x256xf32> to vector<8x128xf32>
    %7 = tpu.iota {dimensions = array<i32: 1>} : vector<8x128xi32>
    %c16_i32 = arith.constant 16 : i32
    %8 = vector.broadcast %c16_i32 : i32 to vector<8x128xi32>
    %9 = arith.cmpi slt, %7, %8 : vector<8x128xi32>
    %cst_5 = arith.constant -1.000000e+30 : f32
    %10 = vector.broadcast %cst_5 : f32 to vector<8x128xf32>
    %11 = arith.select %9, %6, %10 : vector<8x128xi1>, vector<8x128xf32>
    %cst_6 = arith.constant dense<0xFF800000> : vector<8xf32>
    %12 = vector.multi_reduction <maximumf>, %11, %cst_6 [1] : vector<8x128xf32> to vector<8xf32>
    %13 = vector.shape_cast %12 : vector<8xf32> to vector<8x1xf32>
    %14 = vector.broadcast %13 : vector<8x1xf32> to vector<8x128xf32>
    %15 = arith.subf %6, %14 : vector<8x128xf32>
    %16 = math.exp %15 : vector<8x128xf32>
    %cst_7 = arith.constant 0.000000e+00 : f32
    %17 = vector.broadcast %cst_7 : f32 to vector<8x128xf32>
    %18 = arith.select %9, %16, %17 : vector<8x128xi1>, vector<8x128xf32>
    %cst_8 = arith.constant dense<0.000000e+00> : vector<8xf32>
    %19 = vector.multi_reduction <add>, %18, %cst_8 [1] : vector<8x128xf32> to vector<8xf32>
    %20 = vector.shape_cast %19 : vector<8xf32> to vector<8x1xf32>
    %21 = vector.broadcast %20 : vector<8x1xf32> to vector<8x128xf32>
    %22 = arith.divf %18, %21 : vector<8x128xf32>
    %c0_9 = arith.constant 0 : index
    %c0_10 = arith.constant 0 : index
    %23 = vector.load %arg5[%c0_9, %c0_10] : memref<8x256xf32, #tpu.memory_space<vmem>>, vector<8x128xf32>
    tpu.vector_store %arg5[%c0_9, %c0_10], %22 {strides = array<i32>} : memref<8x256xf32, #tpu.memory_space<vmem>>, vector<8x128xf32>,
    %24 = vector.extract_strided_slice %5 {offsets = [0, 128], sizes = [8, 128], strides = [1, 1]} : vector<8x256xf32> to vector<8x128xf32>
    %25 = math.absf %24 : vector<8x128xf32>
    %cst_11 = arith.constant 0.000000e+00 : f32
    %26 = vector.broadcast %cst_11 : f32 to vector<8x128xf32>
    %27 = arith.subf %26, %25 : vector<8x128xf32>
    %28 = math.exp %27 : vector<8x128xf32>
    %cst_12 = arith.constant 0.000000e+00 : f32
    %29 = vector.broadcast %cst_12 : f32 to vector<8x128xf32>
    %30 = arith.cmpf oge, %24, %29 : vector<8x128xf32>
    %cst_13 = arith.constant 1.000000e+00 : f32
    %31 = vector.broadcast %cst_13 : f32 to vector<8x128xf32>
    %32 = arith.addf %31, %28 : vector<8x128xf32>
    %cst_14 = arith.constant 1.000000e+00 : f32
    %33 = vector.broadcast %cst_14 : f32 to vector<8x128xf32>
    %34 = arith.divf %33, %32 : vector<8x128xf32>
    %cst_15 = arith.constant 1.000000e+00 : f32
    %35 = vector.broadcast %cst_15 : f32 to vector<8x128xf32>
    %36 = arith.addf %35, %28 : vector<8x128xf32>
    %37 = arith.divf %28, %36 : vector<8x128xf32>
    %38 = arith.select %30, %34, %37 : vector<8x128xi1>, vector<8x128xf32>
    %c0_16 = arith.constant 0 : index
    %c128 = arith.constant 128 : index
    %39 = vector.load %arg5[%c0_16, %c128] : memref<8x256xf32, #tpu.memory_space<vmem>>, vector<8x128xf32>
    tpu.vector_store %arg5[%c0_16, %c128], %38 {strides = array<i32>} : memref<8x256xf32, #tpu.memory_space<vmem>>, vector<8x128xf32>,
    return
  }
  func.func @transform_0(%arg0: i32, %arg1: i32) -> (i32, i32) {
    %c0_i32 = arith.constant 0 : i32
    return %arg0, %arg1 : i32, i32
  }
  func.func @transform_1(%arg0: i32, %arg1: i32) -> (i32, i32) {
    %c0_i32 = arith.constant 0 : i32
    %c0_i32_0 = arith.constant 0 : i32
    %c0_i32_1 = arith.constant 0 : i32
    return %c0_i32, %c0_i32_0 : i32, i32
  }
  func.func @transform_2(%arg0: i32, %arg1: i32) -> (i32, i32) {
    %c0_i32 = arith.constant 0 : i32
    %c0_i32_0 = arith.constant 0 : i32
    %c0_i32_1 = arith.constant 0 : i32
    return %c0_i32, %c0_i32_0 : i32, i32
  }
  func.func @transform_3(%arg0: i32, %arg1: i32) -> (i32, i32) {
    %c0_i32 = arith.constant 0 : i32
    %c0_i32_0 = arith.constant 0 : i32
    return %arg0, %c0_i32 : i32, i32
  }
}

</mosaic_0001>

<bundles_post_ra>
// kernel: tpu_custom_call.1
= control target key start
LH: loop header
LB: loop body
LE: loop exit
PB: predicated region body
PF: predicated region fallthrough
CT: control target
= control target key end

     0   :  { %6 = vsyncpa [#allocation3], 0  ;;  %s453_s0 = inlined_call_operand.hbm [shape: f32[8,128], index: 0, kind: input, shape index: {}]   ;;  %s454_s1 = inlined_call_operand.hbm [shape: f32[16,128], index: 1, kind: output, shape index: {}]  }
   0x1   :  { %7 = vsyncpa [#allocation4], 0 }
   0x2   :  { %9 = vsyncpa [#allocation4 + $0x1], 0  ;;  %s347_s6 = smov 0   ;;  %s349_s7 = smov 0  }
   0x3   :  { %s351_s8 = smov 0   ;;  %s353_s9 = smov 0  }
   0x4 LB: > { %s368_s10 = sadd.s32 4294967295, %s333_s9   ;;  %s183_s11 = sadd.s32 4294967294, %s333_s9   ;;  %s333_s9 = sphi %s353_s9, %s462_s9   ;;  %s329_s8 = sphi %s351_s8, %s461_s8   ;;  %s325_s7 = sphi %s349_s7, %s460_s7   ;;  %s321_s6 = sphi %s347_s6, %s459_s6  }
   0x5   : > { %s372_s12 = sadd.s32 1, %s333_s9   ;;  %s43_s13 = sadd.s32 1, %s329_s8 }
   0x6   : > { %s40_s14 = ssub.s32 %s333_s9, %s372_s12  ;;  %p53_p0 = scmp.ne.s32.totalorder %s329_s8, %s325_s7 }
   0x7   : > { %p41_p1 = scmp.eq.s32.totalorder %s40_s14, 0  ;;  %p54_p2 = scmp.eq.s32.totalorder %s368_s10, 1 }
   0x8   : > { %p59_p3 = scmp.ne.s32.totalorder %s325_s7, %s321_s6  ;;  %p60_p4 = scmp.eq.s32.totalorder %s183_s11, 1 }
   0x9   : > { %s383_s15 = scalar_select %p41_p1, %s329_s8, %s43_s13  }
   0xa   : > { %p385_p5 = por %p54_p2, %p53_p0  ;;  %p389_p6 = por %p60_p4, %p59_p3 }
   0xb   : > { %p184_p7 = scmp.ge.s32.totalorder %s333_s9, 1  ;;  %p67_p8 = scmp.lt.s32.totalorder %s333_s9, 3 }
   0xc   : > { %s456_s17 = scalar_select %p389_p6, 1, 0 }
   0xd   : > { %p207_p9 = scmp.eq.s32.totalorder %s368_s10, 0  ;;  %p396_p10 = pnand %p184_p7, %p67_p8 }
   0xe   : > { %s335_s19 = smov [#allocation2]  }
   0xf   : > { %s80_s20 = sshll.u32 %s335_s19, 4  ;;  %p199_p11 = pneg %p396_p10  ;;  %s81_s20 = int_to_ptr.vmem [resolvable:$true] %s80_s20 }
  0x10   : > { %s254_s21 = scalar_lea.vmem %s81_s20, 128  ;;  %p262_p3 = scmp.lt.s32.totalorder %s81_s20, %s81_s20 }
  0x11   : > { %p200_p12 = pnand %p207_p9, %p199_p11  ;;  %p255_p0 = scmp.ne.s32.totalorder %s81_s20, %s254_s21 }
  0x12   : > { %p263_p4 = scmp.lt.s32.totalorder %s254_s21, %s254_s21 }
  0x13   : > { %p245_p13 = pneg %p200_p12 }
  0x14   : > { %p264_p6 = por %p263_p4, %p262_p3 }
  0x15   : > { %p257_p1 = pnand %p255_p0, %p245_p13 }
  0x17   : > { %p258_p2 = pneg %p257_p1 }
  0x19   : > { %p265_p7 = pnand %p264_p6, %p258_p2 }
  0x1b   : > { %268 = shalt.err (!%p265_p7)
}
  0x1c   : > { %202 = dma.hbm_to_vmem [thread:$0]  (!%p200_p12), %s453_s0, 128, %s81_s20, [#allocation3]  }
  0x1d   : > { %93 = sbr.rel (%p396_p10) target bundleno = 60 (0x3c), region = 24 }
  0x22   : > { %312 = dma.done.wait (%p207_p9), [#allocation3], 128  }
  0x23   : > { %314 = vsyncadd (%p207_p9), [#allocation3], 4294967168  ;;  %s105_s24 = sand.u32 1, %s325_s7   ;;  %s190_s28 = sshll.u32 %s368_s10, 7  ;;  %v108_v0 = vld [vmem:[#allocation2] sm:$0xff] }
  0x24   : > { %s188_s25 = sshll.u32 %s105_s24, 3  ;;  %s122_s2 = scalar_lea.hbm %s454_s1, %s190_s28 }
  0x25   : > { %s107_s26 = scalar_lea.vmem [#allocation5], %s188_s25  ;;  %s111_s3 = scalar_lea.sflag [#allocation4], %s105_s24 }
  0x26   : > { %s124_s27 = sshll.u32 %s107_s26, 4  ;;  %109 = vst [vmem:[%s107_s26] sm:$0xff] %v108_v0  ;;  %s336_s5 = smov [#allocation5]   ;;  %s415_s27 = int_to_ptr.vmem [resolvable:$true] %s124_s27 }
  0x27   : > { %s269_s4 = scalar_lea.vmem %s415_s27, 128  ;;  %s273_s11 = sshll.u32 %s336_s5, 4  ;;  %s274_s11 = int_to_ptr.vmem [resolvable:$false] %s273_s11 }
  0x28   : > { %p270_p6 = scmp.ne.s32.totalorder %s415_s27, %s269_s4  ;;  %s275_s10 = scalar_lea.vmem %s274_s11, 256 }
  0x29   : > { %p276_p10 = scmp.lt.s32.totalorder %s415_s27, %s274_s11  ;;  %p277_p11 = scmp.lt.s32.totalorder %s275_s10, %s269_s4 }
  0x2a   : > { %p271_p8 = pnand %p270_p6, %p385_p5 }
  0x2b   : > { %p278_p12 = por %p277_p11, %p276_p10 }
  0x2c   : > { %p272_p9 = pneg %p271_p8 }
  0x2e   : > { %p279_p13 = pnand %p278_p12, %p272_p9 }
  0x30   : > { %282 = shalt.err (!%p279_p13)
}
  0x31   : > { %s283_s13 = scalar_lea.hbm %s122_s2, 128  ;;  %s287_s19 = scalar_lea.hbm %s454_s1, 256 }
  0x32   : > { %p284_p0 = scmp.ne.s32.totalorder %s122_s2, %s283_s13  ;;  %p288_p3 = scmp.lt.s32.totalorder %s122_s2, %s454_s1 }
  0x33   : > { %p289_p4 = scmp.lt.s32.totalorder %s287_s19, %s283_s13 }
  0x34   : > { %p285_p1 = pnand %p284_p0, %p385_p5 }
  0x35   : > { %p290_p7 = por %p289_p4, %p288_p3 }
  0x36   : > { %p286_p2 = pneg %p285_p1 }
  0x38   : > { %p291_p6 = pnand %p290_p7, %p286_p2 }
  0x3a   : > { %294 = shalt.err (!%p291_p6)
}
  0x3b   : > { %197 = dma.vmem_to_hbm [thread:$0]  (%p385_p5), %s415_s27, 128, %s122_s2, %s111_s3  }
  0x3c PF: > { %p209_p8 = scmp.ge.s32.totalorder %s333_s9, 2  ;;  %s136_s22 = sand.u32 1, %s321_s6  }
  0x3d   : > { %p458_p9 = scmp.ne.s32.totalorder %s456_s17, 0  ;;  %s137_s23 = scalar_lea.sflag [#allocation4], %s136_s22 }
  0x3f   : > { %p204_p10 = pnand %p209_p8, %p458_p9 }
  0x41   : > { %p205_p11 = pneg %p204_p10 }
  0x43   : > { %316 = dma.done.wait (%p205_p11), %s137_s23, 128  }
  0x44   : > { %318 = vsyncadd (%p205_p11), %s137_s23, 4294967168  ;;  %p12_p12 = scmp.ge.s32.totalorder %s372_s12, 4   ;;  %s459_s6 = smov %s325_s7 }
  0x45   : > { %s460_s7 = smov %s329_s8  ;;  %s461_s8 = smov %s383_s15 }
  0x46   : > { %s462_s9 = smov %s372_s12  ;;  %14 = sbr.rel (!%p12_p12) target bundleno = 4 (0x4), region = 61 }
  0x4b   :  { %142 = vsyncpa [#allocation3], 1 }
  0x4c   :  { %144 = vsyncpa [#allocation3 + $0x1], 1 }
  0x4d   :  { %145 = vsyncpa [#allocation4], 1 }
  0x4e   :  { %147 = vsyncpa [#allocation4 + $0x1], 1 }

// kernel: tpu_custom_call.1
= control target key start
LH: loop header
LB: loop body
LE: loop exit
PB: predicated region body
PF: predicated region fallthrough
CT: control target
= control target key end

     0   :  { %8 = vsyncpa [#allocation3], 0  ;;  %s297_s0 = inlined_call_operand.hbm [shape: bf16[8,32], index: 0, kind: input, shape index: {}]   ;;  %s298_s1 = inlined_call_operand.hbm [shape: bf16[32,256], index: 1, kind: input, shape index: {}]   ;;  %s299_s2 = inlined_call_operand.vmem [shape: f32[1,256], index: 2, kind: input, shape index: {}]   ;;  %s300_s3 = inlined_call_operand.hbm [shape: f32[8,256], index: 3, kind: output, shape index: {}]  }
   0x1   :  { %9 = vsyncpa [#allocation6], 0 }
   0x2   :  { %10 = vsyncpa [#allocation4], 0  ;;  %s257_s12 = smov [#allocation2]   ;;  %s258_s14 = smov [#allocation5]  }
   0x3   :  { %s17_s13 = sshll.u32 %s257_s12, 4  ;;  %s26_s15 = sshll.u32 %s258_s14, 4  ;;  %s18_s13 = int_to_ptr.vmem [resolvable:$true] %s17_s13  ;;  %s27_s15 = int_to_ptr.vmem [resolvable:$true] %s26_s15 }
   0x4   :  { %s199_s16 = scalar_lea.vmem %s18_s13, 64  ;;  %p204_p1 = scmp.lt.s32.totalorder %s18_s13, %s18_s13 }
   0x5   :  { %p200_p0 = scmp.ne.s32.totalorder %s18_s13, %s199_s16  ;;  %p205_p2 = scmp.lt.s32.totalorder %s199_s16, %s199_s16 }
   0x7   :  { %p206_p3 = por %p205_p2, %p204_p1 }
   0x9   :  { %p207_p4 = pnand %p206_p3, %p200_p0 }
   0xb   :  { %210 = shalt.err (!%p207_p4)
}
   0xc   :  { %20 = dma.hbm_to_vmem [thread:$0]  %s297_s0, 64, %s18_s13, [#allocation3]  }
   0xd   :  { %s219_s19 = scalar_lea.vmem %s27_s15, 512  ;;  %p224_p6 = scmp.lt.s32.totalorder %s27_s15, %s27_s15 }
   0xe   :  { %p220_p5 = scmp.ne.s32.totalorder %s27_s15, %s219_s19  ;;  %p225_p7 = scmp.lt.s32.totalorder %s219_s19, %s219_s19 }
  0x10   :  { %p226_p8 = por %p225_p7, %p224_p6 }
  0x12   :  { %p227_p9 = pnand %p226_p8, %p220_p5 }
  0x14   :  { %230 = shalt.err (!%p227_p9)
}
  0x15   :  { %s259_s20 = smov 128   ;;  %s260_s21 = smov 8  }
  0x16   :  { %32 = dma.hbm_to_vmem [thread:$0]  %s298_s1, 512, %s27_s15, [#allocation6], %s259_s20, %s259_s20, %s260_s21  }
  0x17   :  { %251 = dma.done.wait [#allocation3], 64  }
  0x18   :  { %252 = vsyncadd [#allocation3], 4294967232 }
  0x19   :  { %253 = dma.done.wait [#allocation6], 512  }
  0x1a   :  { %254 = vsyncadd [#allocation6], 4294966784  ;;  %v261_v0 = vmov 0   ;;  %v177_v1 = vld [vmem:[#allocation5 + $0x14] ss:$8 sps:$4 sm:$0xff]   ;;  %vm79_vm0 = vcmask 261120   ;;  %v49_v6 = vlaneseq }
  0x1b   :  { %115 = vmatprep.mubr.bf16.mxu0 %v261_v0  ;;  %v179_v2 = vld [vmem:[#allocation5 + $0x10] ss:$8 sps:$4 sm:$0xff]   ;;  %95 = vmatprep.subr.bf16.mxu0 %v177_v1  ;;  %v180_v3 = vld [vmem:[#allocation5 + $0x4] ss:$8 sps:$4 sm:$0xff]   ;;  %v182_v4 = vld [vmem:[#allocation5] ss:$8 sps:$4 sm:$0xff]  }
  0x1c   :  { %96 = vmatpush1.bf16.msra.mxu0 %v179_v2  ;;  %v42_v5 = vld [vmem:[#allocation2] sm:$0xf]  ;;  %v50_v7 = vshrl.u32 %v49_v6, 7  ;;  %v125_v11 = vand.u32 127, %v49_v6 }
  0x1d   :  { %97 = vmatprep.subr.bf16.mxu0 %v180_v3  ;;  %v47_v9 = vld [vmem:[%s299_s2] sm:$0x3]  ;;  %s262_s2 = smov [#allocation7]  }
  0x1e   :  { %v51_v8 = vsub.s32 0, %v50_v7  ;;  %v55_v10 = vsub.s32 1, %v50_v7  ;;  %vm126_vm1 = vcmp.lt.s32.totalorder %v125_v11, 16  ;;  %s156_s24 = sshll.u32 %s262_s2, 4  ;;  %s157_s24 = int_to_ptr.vmem [resolvable:$true] %s156_s24 }
  0x1f   :  { %s231_s25 = scalar_lea.vmem %s157_s24, 256  ;;  %p236_p11 = scmp.lt.s32.totalorder %s157_s24, %s157_s24 }
  0x20   :  { %98 = vmatpush1.bf16.msra.mxu0 %v182_v4  ;;  %v52_v12 = vrot.slane %v47_v9, %v51_v8  ;;  %v56_v13 = vrot.slane %v47_v9, %v55_v10  ;;  %p232_p10 = scmp.ne.s32.totalorder %s157_s24, %s231_s25  ;;  %p237_p12 = scmp.lt.s32.totalorder %s231_s25, %s231_s25 }
  0x22   :  { %p238_p13 = por %p237_p12, %p236_p11 }
  0x23   :  { %170 = vmatmul.mubr.msk.bf16.vlgmr.msra.gmra.mxu0 %vm79_vm0, %v42_v5 }
  0x24   :  { %p239_p0 = pnand %p238_p13, %p232_p10 }
  0xe3   :  { %v117_v14 = vpop.f32.mrf.mxu0 }
  0xe4   :  { %v118_v15 = vadd.f32 %v117_v14, %v52_v12 }
  0xe5   :  { %v119_v16 = vpop.f32.mrf.mxu0 }
  0xe6   :  { %v120_v17 = vadd.f32 %v119_v16, %v56_v13  ;;  %v127_v18 = vsel %vm126_vm1, %v118_v15, -1e+30 }
  0xe7   :  { %v121_v19 = vpop.f32.mrf.mxu0  ;;  %128 = vmax.xlane.f32.xlu0 %v127_v18 }
  0xe8   :  { %v139_v20 = vand.u32 2147483647, %v120_v17  ;;  %vm143_vm2 = vcmp.ge.f32.partialorder %v120_v17, 0.0 }
  0xe9   :  { %v122_v21 = vpop.f32.mrf.mxu0 }
  0xea   :  { %v140_v22 = vsub.f32 0.0, %v139_v20 }
  0xec   :  { %v141_v23 = vmul.f32 1.442695, %v140_v22 }
  0xee   :  { %183 = vpow2.f32 %v141_v23 }
  0xfb   :  { %v184_v24 = vpop.eup %183 }
  0xfc   :  { %v144_v25 = vadd.f32 1.0, %v184_v24 }
  0xfe   :  { %185 = vrcp.f32 %v144_v25 }
 0x10b   :  { %v186_v26 = vpop.eup %185 }
 0x10c   :  { %v147_v27 = vmul.f32 %v186_v26, %v184_v24 }
 0x10e   :  { %v148_v28 = vsel %vm143_vm2, %v186_v26, %v147_v27 }
 0x10f   :  { %149 = vst [vmem:[#allocation7 + $0x8] sm:$0xff] %v148_v28 }
 0x170   :  { %v129_v29 = vpop.xlane.xlu0 %128 }
 0x171   :  { %v130_v30 = vsub.f32 %v118_v15, %v129_v29 }
 0x173   :  { %v131_v31 = vmul.f32 1.442695, %v130_v30 }
 0x175   :  { %187 = vpow2.f32 %v131_v31 }
 0x182   :  { %v188_v32 = vpop.eup %187 }
 0x183   :  { %v133_v33 = vsel %vm126_vm1, %v188_v32, 0.0 }
 0x184   :  { %134 = vadd.xlane.f32.xlu0 %v133_v33 }
 0x20d   :  { %v135_v34 = vpop.xlane.xlu0 %134 }
 0x20e   :  { %189 = vrcp.f32 %v135_v34 }
 0x21b   :  { %v190_v35 = vpop.eup %189 }
 0x21c   :  { %v137_v36 = vmul.f32 %v190_v35, %v133_v33 }
 0x21e   :  { %138 = vst [vmem:[#allocation7] sm:$0xff] %v137_v36 }
 0x21f   :  { %242 = shalt.err (!%p239_p0)
}
 0x220   :  { %159 = dma.vmem_to_hbm [thread:$0]  %s157_s24, 256, %s300_s3, [#allocation4]  }
 0x221   :  { %255 = dma.done.wait [#allocation4], 256  }
 0x222   :  { %256 = vsyncadd [#allocation4], 4294967040 }
 0x223   :  { %163 = vsyncpa [#allocation3], 1 }
 0x224   :  { %164 = vsyncpa [#allocation6], 1 }
 0x225   :  { %165 = vsyncpa [#allocation4], 1 }

</bundles_post_ra>
